<compile_context>
chip_gen: v5e
topology: v5e:2x2
jax: 0.10.0
libtpu: 0.0.40
codegen_flags: <defaults>
</compile_context>

<pallas_src>
import jax
import jax.numpy as jnp
from jax.experimental import pallas as pl
from jax.experimental.pallas import tpu as pltpu


# ----------------------------------------------------------------------------
# Helpers
# ----------------------------------------------------------------------------
def _round_up(x: int, m: int) -> int:
    return ((x + m - 1) // m) * m


def _pad2d(a, rows: int, cols: int):
    """Zero-pad a 2-D array up to (rows, cols) via jnp.pad (no-op if exact)."""
    pr, pc = rows - a.shape[0], cols - a.shape[1]
    if pr == 0 and pc == 0:
        return a
    return jnp.pad(a, ((0, pr), (0, pc)))


def _vmem_capacity_bytes() -> int:
    """Per-core VMEM capacity; conservative 64 MiB (v7x-sized) fallback."""
    try:
        return int(pltpu.get_tpu_info().vmem_capacity_bytes)
    except Exception:
        return 64 * 1024 * 1024


def _resident_vmem_bytes(tile_m, d_model_p, d_inner_p, in_sz, w_sz, out_sz):
    """Conservative VMEM estimate for the weight-resident path."""
    return (
        2 * tile_m * d_model_p * in_sz          # x tile (double buffered)
        + 2 * d_model_p * d_inner_p * w_sz      # W1 (count 2 bufs to be safe)
        + 2 * d_inner_p * d_model_p * w_sz      # W2
        + 2 * (d_inner_p + d_model_p) * 4       # biases (f32)
        + 2 * tile_m * d_model_p * out_sz       # out tile
        + tile_m * d_inner_p * 4                # f32 h intermediate
        + tile_m * d_inner_p * w_sz             # h cast copy for 2nd matmul
        + tile_m * d_model_p * 4                # f32 second-matmul result
    )


def _streamed_vmem_bytes(tile_m, tile_h, d_model_p, in_sz, w_sz, out_sz):
    """Conservative VMEM estimate for the d_inner-streaming path."""
    return (
        2 * tile_m * d_model_p * in_sz          # x tile
        + 2 * d_model_p * tile_h * w_sz         # W1 chunk
        + 2 * tile_h * d_model_p * w_sz         # W2 chunk
        + 2 * (tile_h + d_model_p) * 4          # bias chunks (f32)
        + 2 * tile_m * d_model_p * out_sz       # out tile
        + tile_m * d_model_p * 4                # f32 accumulator scratch
        + tile_m * tile_h * 4                   # f32 h intermediate
        + tile_m * tile_h * w_sz                # h cast copy
        + tile_m * d_model_p * 4                # f32 partial product
    )


# ----------------------------------------------------------------------------
# Kernels
# ----------------------------------------------------------------------------
def _ffn_kernel_resident(x_ref, w1_ref, b1_ref, w2_ref, b2_ref, o_ref):
    """Weights fully VMEM-resident: one grid axis over token tiles."""
    h = jnp.dot(x_ref[...], w1_ref[...], preferred_element_type=jnp.float32)
    h = jnp.maximum(h + b1_ref[...], 0.0)            # bias + ReLU in f32
    # F.dropout(..., training=False) is identity -- nothing to do.
    out = jnp.dot(h.astype(w2_ref.dtype), w2_ref[...],
                  preferred_element_type=jnp.float32)
    o_ref[...] = (out + b2_ref[...]).astype(o_ref.dtype)


def _ffn_kernel_streamed(x_ref, w1_ref, b1_ref, w2_ref, b2_ref, o_ref, acc_ref):
    """Streamed d_inner chunks: grid (i token tiles, j d_inner chunks)."""
    j = pl.program_id(1)

    h = jnp.dot(x_ref[...], w1_ref[...], preferred_element_type=jnp.float32)
    h = jnp.maximum(h + b1_ref[...], 0.0)            # bias + ReLU in f32
    partial = jnp.dot(h.astype(w2_ref.dtype), w2_ref[...],
                      preferred_element_type=jnp.float32)

    @pl.when(j == 0)
    def _():
        acc_ref[...] = partial                       # write, no zero-init pass

    @pl.when(j > 0)
    def _():
        acc_ref[...] += partial

    @pl.when(j == pl.num_programs(1) - 1)
    def _():
        o_ref[...] = (acc_ref[...] + b2_ref[...]).astype(o_ref.dtype)


# ----------------------------------------------------------------------------
# Wrapper
# ----------------------------------------------------------------------------
def make_ffn(w1, b1, w2, b2, *, tile_m=256, tile_h=1024,
             mxu_dtype=jnp.bfloat16, out_dtype=None):
    """Build a fused FFN forward: relu(x @ W1 + b1) @ W2 + b2.

    Weights are stored already transposed for x @ W:
      w1: (d_model, d_inner), b1: (1, d_inner)
      w2: (d_inner, d_model), b2: (1, d_model)

    Static parameters are padded / cast ONCE here (outside the hot path).
    mxu_dtype : dtype fed to the MXU for x/W1/W2 (default bf16 -- native MXU
                input dtype on v5e/v6e/v7x); accumulation, bias add and ReLU
                stay f32. Pass None to keep the original dtype (exact f32 path).
    """
    d_model, d_inner = w1.shape
    assert b1.shape == (1, d_inner)
    assert w2.shape == (d_inner, d_model)
    assert b2.shape == (1, d_model)

    d_model_p = _round_up(d_model, 128)
    w_dtype = mxu_dtype if mxu_dtype is not None else w1.dtype
    w_sz = jnp.dtype(w_dtype).itemsize
    in_sz = w_sz                       # x is cast to the same MXU dtype
    out_sz_ub = 4                      # upper bound for sizing (<= f32 outputs)

    vmem_cap = _vmem_capacity_bytes()
    budget = int(0.80 * vmem_cap)      # ~100 MiB on 128 MiB parts, ~51 MiB on v7x

    tile_m_cfg = max(_round_up(tile_m, 8), 8)
    d_inner_128 = _round_up(d_inner, 128)

    # ---- choose execution path & static tile sizes --------------------------
    resident = _resident_vmem_bytes(tile_m_cfg, d_model_p, d_inner_128,
                                    in_sz, w_sz, out_sz_ub) <= budget
    if resident:
        tile_h_cfg = d_inner_128
        d_inner_p = d_inner_128
    else:
        tile_h_cfg = min(_round_up(max(tile_h, 128), 128), d_inner_128)
        while (tile_h_cfg > 128 and
               _streamed_vmem_bytes(tile_m_cfg, tile_h_cfg, d_model_p,
                                    in_sz, w_sz, out_sz_ub) > budget):
            tile_h_cfg = max(128, (tile_h_cfg // 2 // 128) * 128)
        while (tile_m_cfg > 128 and
               _streamed_vmem_bytes(tile_m_cfg, tile_h_cfg, d_model_p,
                                    in_sz, w_sz, out_sz_ub) > budget):
            tile_m_cfg = max(128, _round_up(tile_m_cfg // 2, 8))
        # Zero-pad d_inner up to a multiple of the chunk: padded columns of W1
        # and rows of W2 are exact zeros => chunks contribute exactly zero.
        d_inner_p = _round_up(d_inner, tile_h_cfg)

    # ---- pad / cast static parameters ONCE (outside the hot path) -----------
    # TODO(synk): optional fp8 weight path for v7x (opt-in accuracy tradeoff) not added.
    w1_p = _pad2d(w1, d_model_p, d_inner_p).astype(w_dtype)
    w2_p = _pad2d(w2, d_inner_p, d_model_p).astype(w_dtype)
    b1_p = _pad2d(b1, 1, d_inner_p).astype(jnp.float32)
    b2_p = _pad2d(b2, 1, d_model_p).astype(jnp.float32)
    weight_bytes = int(w1_p.size * w1_p.dtype.itemsize
                       + w2_p.size * w2_p.dtype.itemsize
                       + b1_p.size * 4 + b2_p.size * 4)

    def ffn(x):
        B, S, dm = x.shape
        assert dm == d_model
        M = B * S
        odt = out_dtype if out_dtype is not None else x.dtype
        odt_sz = jnp.dtype(odt).itemsize

        # Token tile: as big as configured, but keep >= 2 tiles whenever M
        # allows so the "parallel" i axis can be split across v7x's 2 TCs.
        tm = min(tile_m_cfg, _round_up(M, 8))
        while pl.cdiv(M, tm) < 2 and tm > 128:
            tm = max(128, _round_up(tm // 2, 8))
        num_i = pl.cdiv(M, tm)

        # x: only lane (d_model) padding if needed; M is never padded (partial
        # last block -> OOB rows only affect rows that are masked on writeback).
        x2d = x.reshape(M, d_model)
        if d_model_p != d_model:
            x2d = jnp.pad(x2d, ((0, 0), (0, d_model_p - d_model)))
        if mxu_dtype is not None:
            x2d = x2d.astype(mxu_dtype)

        if resident:
            grid = (num_i,)
            in_specs = [
                pl.BlockSpec((tm, d_model_p), lambda i: (i, 0)),          # x tile
                pl.BlockSpec((d_model_p, d_inner_p), lambda i: (0, 0)),   # W1 (resident)
                pl.BlockSpec((1, d_inner_p), lambda i: (0, 0)),           # b1
                pl.BlockSpec((d_inner_p, d_model_p), lambda i: (0, 0)),   # W2 (resident)
                pl.BlockSpec((1, d_model_p), lambda i: (0, 0)),           # b2
            ]
            out_specs = pl.BlockSpec((tm, d_model_p), lambda i: (i, 0))
            scratch = []
            kernel = _ffn_kernel_resident
            dims = ("parallel",)
            est = _resident_vmem_bytes(tm, d_model_p, d_inner_p,
                                       x2d.dtype.itemsize, w_sz, odt_sz)
            weight_passes = 1
        else:
            grid = (num_i, d_inner_p // tile_h_cfg)
            in_specs = [
                pl.BlockSpec((tm, d_model_p), lambda i, j: (i, 0)),        # x tile
                pl.BlockSpec((d_model_p, tile_h_cfg), lambda i, j: (0, j)),# W1 chunk
                pl.BlockSpec((1, tile_h_cfg), lambda i, j: (0, j)),        # b1 chunk
                pl.BlockSpec((tile_h_cfg, d_model_p), lambda i, j: (j, 0)),# W2 chunk
                pl.BlockSpec((1, d_model_p), lambda i, j: (0, 0)),         # b2
            ]
            out_specs = pl.BlockSpec((tm, d_model_p), lambda i, j: (i, 0))
            scratch = [pltpu.VMEM((tm, d_model_p), jnp.float32)]
            kernel = _ffn_kernel_streamed
            dims = ("parallel", "arbitrary")
            est = _streamed_vmem_bytes(tm, tile_h_cfg, d_model_p,
                                       x2d.dtype.itemsize, w_sz, odt_sz)
            weight_passes = num_i   # weights are re-streamed per token tile

        flops = 4 * M * d_model * d_inner
        bytes_accessed = int(x2d.size * x2d.dtype.itemsize
                             + weight_passes * weight_bytes
                             + M * d_model_p * odt_sz)
        cost = pl.CostEstimate(flops=flops, transcendentals=0,
                               bytes_accessed=bytes_accessed)

        vmem_limit = int(min(0.92 * vmem_cap,
                             max(1.25 * est, 32 * 1024 * 1024)))

        out_p = pl.pallas_call(
            kernel,
            out_shape=jax.ShapeDtypeStruct((M, d_model_p), odt),
            grid_spec=pltpu.PrefetchScalarGridSpec(
                num_scalar_prefetch=0,
                grid=grid,
                in_specs=in_specs,
                out_specs=out_specs,
                scratch_shapes=scratch,
            ),
            compiler_params=pltpu.CompilerParams(
                dimension_semantics=dims,
                vmem_limit_bytes=vmem_limit,
            ),
            cost_estimate=cost,
        )(x2d, w1_p, b1_p, w2_p, b2_p)

        out = out_p[:, :d_model] if d_model_p != d_model else out_p
        return out.reshape(B, S, d_model)

    return ffn


def ffn_pallas(x, w1, b1, w2, b2, **kwargs):
    """One-shot convenience wrapper (prefer make_ffn to cache padded params)."""
    return make_ffn(w1, b1, w2, b2, **kwargs)(x)


def ffn_reference(x, w1, b1, w2, b2):
    h = jnp.maximum(jnp.einsum("bsd,dh->bsh", x, w1) + b1[0], 0.0)
    return jnp.einsum("bsh,hd->bsd", h, w2) + b2[0]


# TODO(synk): training-mode dropout (p>0, training=True) would require
# pltpu.prng_seed/prng_random_bits masking; the module uses training=False => identity.


if __name__ == "__main__":
    # Small shapes consistent with FFN(d_inner_hid=64, d_model=32, dropout_rate=0.1)
    B, S, d_model, d_inner = 2, 8, 32, 64

    key = jax.random.PRNGKey(0)
    kx, kw1, kb1, kw2, kb2 = jax.random.split(key, 5)

    x = jax.random.normal(kx, (B, S, d_model), dtype=jnp.float32)
    # Deterministic synthetic parameters (nn.Linear weights, stored transposed).
    w1 = jax.random.normal(kw1, (d_model, d_inner), dtype=jnp.float32) * 0.05
    b1 = jax.random.normal(kb1, (1, d_inner), dtype=jnp.float32) * 0.05
    w2 = jax.random.normal(kw2, (d_inner, d_model), dtype=jnp.float32) * 0.05
    b2 = jax.random.normal(kb2, (1, d_model), dtype=jnp.float32) * 0.05

    ref = ffn_reference(x, w1, b1, w2, b2)

    # Exact path: f32 MXU inputs (matches the PyTorch f32 forward tightly).
    ffn_f32 = make_ffn(w1, b1, w2, b2, mxu_dtype=None)
    out_f32 = jax.block_until_ready(ffn_f32(x))
    assert out_f32.shape == (B, S, d_model)
    assert jnp.allclose(out_f32, ref, atol=1e-5, rtol=1e-5)

    # Default fast path: bf16 MXU inputs, f32 accumulation / bias / ReLU.
    ffn_bf16 = make_ffn(w1, b1, w2, b2)   # mxu_dtype defaults to bfloat16
    out_bf16 = jax.block_until_ready(ffn_bf16(x))
    assert out_bf16.shape == (B, S, d_model)
    assert jnp.allclose(out_bf16, ref, atol=3e-2, rtol=3e-2)

    print("KERNEL_OK")
</pallas_src>

<mosaic_0001>
module attributes {stable_mosaic.version = 11 : i64} {
  func.func @_ffn_kernel_resident(%arg0: i32, %arg1: memref<16x128xf32, #tpu.memory_space<vmem>>, %arg2: memref<128x128xf32, #tpu.memory_space<vmem>>, %arg3: memref<1x128xf32, #tpu.memory_space<vmem>>, %arg4: memref<128x128xf32, #tpu.memory_space<vmem>>, %arg5: memref<1x128xf32, #tpu.memory_space<vmem>>, %arg6: memref<16x128xf32, #tpu.memory_space<vmem>>) attributes {dimension_semantics = [#tpu.dimension_semantics<parallel>], iteration_bounds = array<i64: 1>, scalar_prefetch = 0 : i64, scratch_operands = 0 : i64, tpu.core_type = #tpu.core_type<tc>, window_params = [{transform_indices = @transform_0, window_bounds = array<i64: 16, 128>}, {pipeline_mode = #tpu.pipeline_mode<synchronous>, transform_indices = @transform_1, window_bounds = array<i64: 128, 128>}, {pipeline_mode = #tpu.pipeline_mode<synchronous>, transform_indices = @transform_2, window_bounds = array<i64: 1, 128>}, {pipeline_mode = #tpu.pipeline_mode<synchronous>, transform_indices = @transform_3, window_bounds = array<i64: 128, 128>}, {pipeline_mode = #tpu.pipeline_mode<synchronous>, transform_indices = @transform_4, window_bounds = array<i64: 1, 128>}, {transform_indices = @transform_5, window_bounds = array<i64: 16, 128>}]} {
    %c0 = arith.constant 0 : index
    %c0_0 = arith.constant 0 : index
    %0 = vector.load %arg1[%c0, %c0_0] : memref<16x128xf32, #tpu.memory_space<vmem>>, vector<16x128xf32>
    %c0_1 = arith.constant 0 : index
    %c0_2 = arith.constant 0 : index
    %1 = vector.load %arg2[%c0_1, %c0_2] : memref<128x128xf32, #tpu.memory_space<vmem>>, vector<128x128xf32>
    %cst = arith.constant dense<0.000000e+00> : vector<16x128xf32>
    %2 = tpu.matmul %0, %1, %cst {dimension_numbers = #tpu.dot_dimension_numbers<[1], [0], [0], [1], [0, 0, 1, 1], [], []>} : vector<16x128xf32>, vector<128x128xf32>, vector<16x128xf32> -> vector<16x128xf32>
    %c0_3 = arith.constant 0 : index
    %c0_4 = arith.constant 0 : index
    %3 = vector.load %arg3[%c0_3, %c0_4] : memref<1x128xf32, #tpu.memory_space<vmem>>, vector<1x128xf32>
    %4 = vector.broadcast %3 : vector<1x128xf32> to vector<16x128xf32>
    %5 = arith.addf %2, %4 : vector<16x128xf32>
    %cst_5 = arith.constant 0.000000e+00 : f32
    %6 = vector.broadcast %cst_5 : f32 to vector<16x128xf32>
    %7 = arith.maximumf %5, %6 : vector<16x128xf32>
    %c0_6 = arith.constant 0 : index
    %c0_7 = arith.constant 0 : index
    %8 = vector.load %arg4[%c0_6, %c0_7] : memref<128x128xf32, #tpu.memory_space<vmem>>, vector<128x128xf32>
    %cst_8 = arith.constant dense<0.000000e+00> : vector<16x128xf32>
    %9 = tpu.matmul %7, %8, %cst_8 {dimension_numbers = #tpu.dot_dimension_numbers<[1], [0], [0], [1], [0, 0, 1, 1], [], []>} : vector<16x128xf32>, vector<128x128xf32>, vector<16x128xf32> -> vector<16x128xf32>
    %c0_9 = arith.constant 0 : index
    %c0_10 = arith.constant 0 : index
    %10 = vector.load %arg5[%c0_9, %c0_10] : memref<1x128xf32, #tpu.memory_space<vmem>>, vector<1x128xf32>
    %11 = vector.broadcast %10 : vector<1x128xf32> to vector<16x128xf32>
    %12 = arith.addf %9, %11 : vector<16x128xf32>
    %c0_11 = arith.constant 0 : index
    %c0_12 = arith.constant 0 : index
    %13 = vector.load %arg6[%c0_11, %c0_12] : memref<16x128xf32, #tpu.memory_space<vmem>>, vector<16x128xf32>
    tpu.vector_store %arg6[%c0_11, %c0_12], %12 {strides = array<i32>} : memref<16x128xf32, #tpu.memory_space<vmem>>, vector<16x128xf32>,
    return
  }
  func.func @transform_0(%arg0: i32) -> (i32, i32) {
    %c0_i32 = arith.constant 0 : i32
    %c0_i32_0 = arith.constant 0 : i32
    return %arg0, %c0_i32 : i32, i32
  }
  func.func @transform_1(%arg0: i32) -> (i32, i32) {
    %c0_i32 = arith.constant 0 : i32
    %c0_i32_0 = arith.constant 0 : i32
    %c0_i32_1 = arith.constant 0 : i32
    return %c0_i32, %c0_i32_0 : i32, i32
  }
  func.func @transform_2(%arg0: i32) -> (i32, i32) {
    %c0_i32 = arith.constant 0 : i32
    %c0_i32_0 = arith.constant 0 : i32
    %c0_i32_1 = arith.constant 0 : i32
    return %c0_i32, %c0_i32_0 : i32, i32
  }
  func.func @transform_3(%arg0: i32) -> (i32, i32) {
    %c0_i32 = arith.constant 0 : i32
    %c0_i32_0 = arith.constant 0 : i32
    %c0_i32_1 = arith.constant 0 : i32
    return %c0_i32, %c0_i32_0 : i32, i32
  }
  func.func @transform_4(%arg0: i32) -> (i32, i32) {
    %c0_i32 = arith.constant 0 : i32
    %c0_i32_0 = arith.constant 0 : i32
    %c0_i32_1 = arith.constant 0 : i32
    return %c0_i32, %c0_i32_0 : i32, i32
  }
  func.func @transform_5(%arg0: i32) -> (i32, i32) {
    %c0_i32 = arith.constant 0 : i32
    %c0_i32_0 = arith.constant 0 : i32
    return %arg0, %c0_i32 : i32, i32
  }
}

</mosaic_0001>

<bundles_post_ra>
// kernel: tpu_custom_call.1
= control target key start
LH: loop header
LB: loop body
LE: loop exit
PB: predicated region body
PF: predicated region fallthrough
CT: control target
= control target key end

     0   :  { %10 = vsyncpa [#allocation3], 0  ;;  %s388_s0 = inlined_call_operand.hbm [shape: f32[16,128], index: 0, kind: input, shape index: {}]   ;;  %s389_s1 = inlined_call_operand.hbm [shape: f32[128,128], index: 1, kind: input, shape index: {}]   ;;  %s390_s2 = inlined_call_operand.vmem [shape: f32[1,128], index: 2, kind: input, shape index: {}]   ;;  %s391_s3 = inlined_call_operand.hbm [shape: f32[128,128], index: 3, kind: input, shape index: {}]   ;;  %s392_s4 = inlined_call_operand.vmem [shape: f32[1,128], index: 4, kind: input, shape index: {}]   ;;  %s393_s5 = inlined_call_operand.hbm [shape: f32[16,128], index: 5, kind: output, shape index: {}]  }
   0x1   :  { %11 = vsyncpa [#allocation6], 0 }
   0x2   :  { %12 = vsyncpa [#allocation4], 0  ;;  %s30_s20 = sshll.u32 %s389_s1, 4  ;;  %s322_s21 = smov [#allocation5]   ;;  %s31_s20 = int_to_ptr.hbm [resolvable:$true] %s30_s20 }
   0x3   :  { %s32_s22 = sshll.u32 %s322_s21, 4  ;;  %s17_s25 = sshll.u32 %s388_s0, 4  ;;  %s33_s22 = int_to_ptr.vmem [resolvable:$true] %s32_s22  ;;  %s18_s25 = int_to_ptr.hbm [resolvable:$true] %s17_s25 }
   0x4   :  { %s323_s26 = smov 128   ;;  %s324_s27 = smov 8  }
   0x5   :  { %38 = dma.hbm_to_vmem [thread:$0]  %s31_s20, 2048, %s33_s22, [#allocation6], %s323_s26, %s323_s26, %s324_s27  }
   0x6   :  { %s325_s28 = smov [#allocation2]   ;;  %s45_s1 = sshll.u32 %s391_s3, 4  ;;  %s46_s1 = int_to_ptr.hbm [resolvable:$true] %s45_s1 }
   0x7   :  { %s19_s29 = sshll.u32 %s325_s28, 4  ;;  %s326_s0 = smov [#allocation7]   ;;  %s20_s29 = int_to_ptr.vmem [resolvable:$true] %s19_s29 }
   0x8   :  { %25 = dma.hbm_to_vmem [thread:$0]  %s18_s25, 256, %s20_s29, [#allocation3], %s323_s26, %s323_s26, %s324_s27  }
   0x9   :  { %s47_s7 = sshll.u32 %s326_s0, 4  ;;  %s48_s7 = int_to_ptr.vmem [resolvable:$true] %s47_s7 }
   0xa   :  { %53 = dma.hbm_to_vmem [thread:$0]  %s46_s1, 2048, %s48_s7, [#allocation6], %s323_s26, %s323_s26, %s324_s27  }
   0xb   :  { %316 = dma.done.wait [#allocation3], 256  }
   0xc   :  { %317 = vsyncadd [#allocation3], 4294967040 }
   0xd   :  { %318 = dma.done.wait [#allocation6], 4096  }
   0xe   :  { %319 = vsyncadd [#allocation6], 4294963200  ;;  %v85_v0 = vld [vmem:[#allocation5 + $0x78] sm:$0xff]  ;;  %v84_v1 = vld [vmem:[#allocation5 + $0x70] sm:$0xff]  ;;  %s327_s11 = smov [#allocation8]  }
   0xf   :  { %180 = vmatpush.msra.mxu2 %v85_v0  ;;  %90 = vmatpush.msra.mxu0 %v85_v0  ;;  %v83_v2 = vld [vmem:[#allocation5 + $0x68] sm:$0xff]  ;;  %v82_v3 = vld [vmem:[#allocation5 + $0x60] sm:$0xff]  ;;  %v81_v4 = vld [vmem:[#allocation5 + $0x58] sm:$0xff]  ;;  %s164_s12 = sshll.u32 %s327_s11, 4  ;;  %s165_s12 = int_to_ptr.vmem [resolvable:$true] %s164_s12 }
  0x10   :  { %v130_v5 = vld [vmem:[#allocation7 + $0x78] sm:$0xff]  ;;  %v129_v6 = vld [vmem:[#allocation7 + $0x70] sm:$0xff]  ;;  %v128_v8 = vld [vmem:[#allocation7 + $0x68] sm:$0xff] }
  0x11   :  { %181 = vmatpush.msra.mxu2 %v84_v1  ;;  %91 = vmatpush.msra.mxu0 %v84_v1  ;;  %v80_v7 = vld [vmem:[#allocation5 + $0x50] sm:$0xff]  ;;  %v79_v9 = vld [vmem:[#allocation5 + $0x48] sm:$0xff]  ;;  %v127_v10 = vld [vmem:[#allocation7 + $0x60] sm:$0xff] }
  0x12   :  { %196 = vmatpush.msra.mxu3 %v130_v5  ;;  %135 = vmatpush.msra.mxu1 %v130_v5  ;;  %v78_v11 = vld [vmem:[#allocation5 + $0x40] sm:$0xff]  ;;  %v126_v12 = vld [vmem:[#allocation7 + $0x58] sm:$0xff]  ;;  %v125_v14 = vld [vmem:[#allocation7 + $0x50] sm:$0xff] }
  0x13   :  { %182 = vmatpush.msra.mxu2 %v83_v2  ;;  %92 = vmatpush.msra.mxu0 %v83_v2  ;;  %v77_v13 = vld [vmem:[#allocation5 + $0x38] sm:$0xff]  ;;  %v76_v15 = vld [vmem:[#allocation5 + $0x30] sm:$0xff]  ;;  %v124_v16 = vld [vmem:[#allocation7 + $0x48] sm:$0xff] }
  0x14   :  { %197 = vmatpush.msra.mxu3 %v129_v6  ;;  %136 = vmatpush.msra.mxu1 %v129_v6  ;;  %v75_v17 = vld [vmem:[#allocation5 + $0x28] sm:$0xff]  ;;  %v123_v18 = vld [vmem:[#allocation7 + $0x40] sm:$0xff]  ;;  %v122_v20 = vld [vmem:[#allocation7 + $0x38] sm:$0xff] }
  0x15   :  { %183 = vmatpush.msra.mxu2 %v82_v3  ;;  %93 = vmatpush.msra.mxu0 %v82_v3  ;;  %v74_v19 = vld [vmem:[#allocation5 + $0x20] sm:$0xff]  ;;  %v73_v21 = vld [vmem:[#allocation5 + $0x18] sm:$0xff]  ;;  %v121_v22 = vld [vmem:[#allocation7 + $0x30] sm:$0xff] }
  0x16   :  { %198 = vmatpush.msra.mxu3 %v128_v8  ;;  %137 = vmatpush.msra.mxu1 %v128_v8  ;;  %v72_v23 = vld [vmem:[#allocation5 + $0x10] sm:$0xff]  ;;  %v120_v24 = vld [vmem:[#allocation7 + $0x28] sm:$0xff]  ;;  %v119_v26 = vld [vmem:[#allocation7 + $0x20] sm:$0xff] }
  0x17   :  { %184 = vmatpush.msra.mxu2 %v81_v4  ;;  %94 = vmatpush.msra.mxu0 %v81_v4  ;;  %v71_v25 = vld [vmem:[#allocation5 + $0x8] sm:$0xff]  ;;  %v70_v27 = vld [vmem:[#allocation5] sm:$0xff]  ;;  %v69_v28 = vld [vmem:[#allocation2 + $0x8] sm:$0xff] }
  0x18   :  { %199 = vmatpush.msra.mxu3 %v127_v10  ;;  %138 = vmatpush.msra.mxu1 %v127_v10  ;;  %v68_v29 = vld [vmem:[#allocation2] sm:$0xff]  ;;  %v118_v30 = vld [vmem:[#allocation7 + $0x18] sm:$0xff]  ;;  %v116_v32 = vld [vmem:[#allocation7 + $0x8] sm:$0xff] }
  0x19   :  { %185 = vmatpush.msra.mxu2 %v80_v7  ;;  %95 = vmatpush.msra.mxu0 %v80_v7  ;;  %v117_v31 = vld [vmem:[#allocation7 + $0x10] sm:$0xff]  ;;  %v115_v33 = vld [vmem:[#allocation7] sm:$0xff] }
  0x1a   :  { %200 = vmatpush.msra.mxu3 %v126_v12  ;;  %139 = vmatpush.msra.mxu1 %v126_v12  ;;  %v218_v34 = vld [vmem:[%s390_s2] ss:$0 sm:$0xff]  ;;  %s166_s2 = sshll.u32 %s393_s5, 4  ;;  %s167_s2 = int_to_ptr.hbm [resolvable:$true] %s166_s2 }
  0x1b   :  { %186 = vmatpush.msra.mxu2 %v79_v9  ;;  %96 = vmatpush.msra.mxu0 %v79_v9  ;;  %v219_v41 = vld [vmem:[%s392_s4] ss:$0 sm:$0xff] }
  0x1c   :  { %201 = vmatpush.msra.mxu3 %v125_v14  ;;  %140 = vmatpush.msra.mxu1 %v125_v14 }
  0x1d   :  { %187 = vmatpush.msra.mxu2 %v78_v11  ;;  %97 = vmatpush.msra.mxu0 %v78_v11 }
  0x1e   :  { %202 = vmatpush.msra.mxu3 %v124_v16  ;;  %141 = vmatpush.msra.mxu1 %v124_v16 }
  0x1f   :  { %188 = vmatpush.msra.mxu2 %v77_v13  ;;  %98 = vmatpush.msra.mxu0 %v77_v13 }
  0x20   :  { %203 = vmatpush.msra.mxu3 %v123_v18  ;;  %142 = vmatpush.msra.mxu1 %v123_v18 }
  0x21   :  { %189 = vmatpush.msra.mxu2 %v76_v15  ;;  %99 = vmatpush.msra.mxu0 %v76_v15 }
  0x22   :  { %204 = vmatpush.msra.mxu3 %v122_v20  ;;  %143 = vmatpush.msra.mxu1 %v122_v20 }
  0x23   :  { %190 = vmatpush.msra.mxu2 %v75_v17  ;;  %100 = vmatpush.msra.mxu0 %v75_v17 }
  0x24   :  { %205 = vmatpush.msra.mxu3 %v121_v22  ;;  %144 = vmatpush.msra.mxu1 %v121_v22 }
  0x25   :  { %191 = vmatpush.msra.mxu2 %v74_v19  ;;  %101 = vmatpush.msra.mxu0 %v74_v19 }
  0x26   :  { %206 = vmatpush.msra.mxu3 %v120_v24  ;;  %145 = vmatpush.msra.mxu1 %v120_v24 }
  0x27   :  { %192 = vmatpush.msra.mxu2 %v73_v21  ;;  %102 = vmatpush.msra.mxu0 %v73_v21 }
  0x28   :  { %207 = vmatpush.msra.mxu3 %v119_v26  ;;  %146 = vmatpush.msra.mxu1 %v119_v26 }
  0x29   :  { %193 = vmatpush.msra.mxu2 %v72_v23  ;;  %103 = vmatpush.msra.mxu0 %v72_v23 }
  0x2a   :  { %208 = vmatpush.msra.mxu3 %v118_v30  ;;  %147 = vmatpush.msra.mxu1 %v118_v30 }
  0x2b   :  { %194 = vmatpush.msra.mxu2 %v71_v25  ;;  %104 = vmatpush.msra.mxu0 %v71_v25 }
  0x2c   :  { %209 = vmatpush.msra.mxu3 %v117_v31  ;;  %148 = vmatpush.msra.mxu1 %v117_v31 }
  0x2d   :  { %195 = vmatpush.msra.mxu2 %v70_v27  ;;  %105 = vmatpush.msra.mxu0 %v70_v27 }
  0x2e   :  { %109 = vmatmul.f32.vlgmr.msra.gmra.mxu2 %v69_v28  ;;  %106 = vmatmul.f32.vlgmr.msra.gmra.mxu0 %v68_v29 }
  0x2f   :  { %210 = vmatpush.msra.mxu3 %v116_v32  ;;  %149 = vmatpush.msra.mxu1 %v116_v32 }
  0x31   :  { %211 = vmatpush.msra.mxu3 %v115_v33  ;;  %150 = vmatpush.msra.mxu1 %v115_v33 }
  0xab   :  { %v107_v35 = vpop.f32.mrf.mxu0 }
  0xac   :  { %v108_v36 = vadd.f32 %v218_v34, %v107_v35 }
  0xae   :  { %v113_v37 = vmax.f32 %v108_v36, 0.0 }
  0xb0   :  { %151 = vmatmul.f32.vlgmr.msra.gmra.mxu1 %v113_v37 }
  0xb1   :  { %v110_v38 = vpop.f32.mrf.mxu2 }
  0xb2   :  { %v111_v39 = vadd.f32 %v218_v34, %v110_v38 }
  0xb4   :  { %v114_v40 = vmax.f32 %v111_v39, 0.0 }
  0xb6   :  { %154 = vmatmul.f32.vlgmr.msra.gmra.mxu3 %v114_v40 }
 0x12d   :  { %v152_v42 = vpop.f32.mrf.mxu1 }
 0x12e   :  { %v153_v43 = vadd.f32 %v219_v41, %v152_v42 }
 0x130   :  { %158 = vst [vmem:[#allocation8] sm:$0xff] %v153_v43 }
 0x139   :  { %v155_v44 = vpop.f32.mrf.mxu3 }
 0x13a   :  { %v156_v45 = vadd.f32 %v219_v41, %v155_v44 }
 0x13c   :  { %159 = vst [vmem:[#allocation8 + $0x8] sm:$0xff] %v156_v45 }
 0x13d   :  { %172 = dma.vmem_to_hbm [thread:$0]  %s165_s12, 256, %s167_s2, [#allocation4], %s323_s26, %s323_s26, %s324_s27  }
 0x13e   :  { %320 = dma.done.wait [#allocation4], 256  }
 0x13f   :  { %321 = vsyncadd [#allocation4], 4294967040 }
 0x140   :  { %177 = vsyncpa [#allocation3], 1 }
 0x141   :  { %178 = vsyncpa [#allocation6], 1 }
 0x142   :  { %179 = vsyncpa [#allocation4], 1 }

</bundles_post_ra>
